<compile_context>
chip_gen: v5e
topology: v5e:2x2
jax: 0.10.0
libtpu: 0.0.40
codegen_flags: <defaults>
</compile_context>

<pallas_src>
import functools

import jax
import jax.numpy as jnp
from jax.experimental import pallas as pl
from jax.experimental.pallas import tpu as pltpu


def _round_up(v: int, m: int) -> int:
    return (v + m - 1) // m * m


def _classifier_kernel(x_ref, w1_ref, ln_ref, w2_ref, b2_ref, o_ref, acc_ref, *,
                       hidden_dim: int, hidden_pad: int):
    """Grid = (batch_tiles, k_tiles); K (input_dim) is the reduction axis."""
    k = pl.program_id(1)

    @pl.when(k == 0)
    def _():
        acc_ref[...] = jnp.zeros_like(acc_ref)

    # Linear 1 partial product (MXU, f32 accumulation).  Inputs stay in their
    # native dtype (f32 or bf16) -- no elementwise upcast before the matmul.
    acc_ref[...] += jnp.dot(x_ref[...], w1_ref[...],
                            preferred_element_type=jnp.float32)

    @pl.when(k == pl.num_programs(1) - 1)
    def _():
        ln = ln_ref[...].astype(jnp.float32)     # (4, Hp): b1, gamma, beta, mask
        b1, gamma, beta, mask = ln[0:1], ln[1:2], ln[2:3], ln[3:4]

        # Bias + ReLU (VPU, f32).
        h = jnp.maximum(acc_ref[...] + b1, 0.0)  # (TB, Hp)

        # LayerNorm over the *real* hidden_dim.  Padded lanes of h are exactly
        # 0 (zero-padded W1 columns / b1 lanes), so the plain sum is already
        # the correct sum; the variance masks the padded lanes with the
        # precomputed mask row (no per-step iota / select).
        inv_h = 1.0 / float(hidden_dim)
        mean = jnp.sum(h, axis=-1, keepdims=True) * inv_h
        centered = h - mean
        if hidden_dim != hidden_pad:
            sq = centered * centered * mask
        else:
            sq = centered * centered
        var = jnp.sum(sq, axis=-1, keepdims=True) * inv_h
        h_norm = centered * jax.lax.rsqrt(var + 1e-5)
        # gamma/beta are 0 in padded lanes -> padded lanes of h_norm become 0.
        h_norm = h_norm * gamma + beta           # (TB, Hp)

        # Linear 2 (MXU) + bias; cast to the weight dtype so a bf16 weight
        # path keeps bf16 MXU inputs (no-op for f32).
        out = jnp.dot(h_norm.astype(w2_ref.dtype), w2_ref[...],
                      preferred_element_type=jnp.float32)
        out = out + b2_ref[...].astype(jnp.float32)   # (TB, Cp)
        o_ref[...] = out.astype(o_ref.dtype)


def _spec(shape, index_map, single_buffer):
    """BlockSpec; single-buffer constant-index operands when supported."""
    if single_buffer:
        try:
            return pl.BlockSpec(shape, index_map, pipeline_mode=pl.Buffered(1))
        except Exception:
            pass
    return pl.BlockSpec(shape, index_map)


@functools.partial(jax.jit, static_argnames=("batch_tile", "k_tile"))
def embedding_classifier_fwd(x, w1, b1, gamma, beta, w2, b2, *,
                             batch_tile=None, k_tile=None):
    """Forward pass of EmbeddingClassifier.

    x:     (B, input_dim)
    w1:    (input_dim, hidden_dim)    (= PyTorch linear1.weight.T)
    b1:    (hidden_dim,)
    gamma: (hidden_dim,)              LayerNorm weight
    beta:  (hidden_dim,)              LayerNorm bias
    w2:    (hidden_dim, num_classes)  (= PyTorch linear2.weight.T)
    b2:    (num_classes,)
    """
    B, d_in = x.shape
    h_dim = w1.shape[1]
    n_cls = w2.shape[1]
    x_item, w1_item, w2_item = (x.dtype.itemsize, w1.dtype.itemsize,
                                w2.dtype.itemsize)

    # Generation-aware VMEM budget (v5e/v6e: 128 MiB, v7x: 64 MiB physical).
    try:
        vmem_cap = int(pltpu.get_tpu_info().vmem_capacity_bytes)
    except Exception:
        vmem_cap = 64 * 1024 * 1024
    budget = int(vmem_cap * 0.8)

    # Lane-dense / MXU-friendly padded sizes.
    dp0 = _round_up(d_in, 128)
    hp = _round_up(h_dim, 128)
    cp = _round_up(n_cls, 128)

    # ---- Adaptive batch tile -------------------------------------------
    if batch_tile is None:
        batch_tile = 512 if vmem_cap >= (96 << 20) else 256
    bt = min(batch_tile, max(8, _round_up(B, 8)))
    # A single oversized tile means a 1-step grid (no dual-TC sharding on
    # v7x, no DMA/compute overlap) -- split it when the batch is large enough.
    if bt > 128 and pl.cdiv(B, bt) < 2:
        bt = max(128, _round_up(pl.cdiv(B, 2), 8))
    nb = pl.cdiv(B, bt)

    # ---- K tile: keep W1 resident when it fits the VMEM budget, otherwise
    # stream it along input_dim into the f32 accumulator. -----------------
    fixed = (hp * cp * w2_item          # W2 (resident, single-buffered)
             + 4 * hp * 4 + cp * 4      # (b1,gamma,beta,mask) stack + b2
             + 2 * bt * cp * 4          # output tile (double-buffered)
             + bt * hp * 4)             # f32 accumulator scratch

    def _need(tk, n_w1_buf):
        return fixed + n_w1_buf * tk * hp * w1_item + 2 * bt * tk * x_item

    if k_tile is not None:
        tk = min(_round_up(k_tile, 128), dp0)
    elif _need(dp0, 1) <= budget:
        tk = dp0                         # fully resident, k_tiles == 1
    else:
        per = 2 * (hp * w1_item + bt * x_item)
        tk = max(128, min(dp0, ((budget - fixed) // max(per, 1)) // 128 * 128))
    dp = _round_up(d_in, tk)             # pad input_dim to a multiple of tk
    nk = dp // tk

    # ---- Wrapper-side padding (feature / hidden / class dims only; the
    # batch dim is left ragged and handled by Pallas edge-block masking). --
    f32 = jnp.float32
    xp = x if dp == d_in else jnp.pad(x, ((0, 0), (0, dp - d_in)))
    w1p = (w1 if (dp == d_in and hp == h_dim)
           else jnp.pad(w1, ((0, dp - d_in), (0, hp - h_dim))))
    w2p = (w2 if (hp == h_dim and cp == n_cls)
           else jnp.pad(w2, ((0, hp - h_dim), (0, cp - n_cls))))

    def _pad_h(v):
        return jnp.pad(v.astype(f32), (0, hp - h_dim))

    lnp = jnp.stack([
        _pad_h(b1), _pad_h(gamma), _pad_h(beta),
        (jnp.arange(hp) < h_dim).astype(f32),   # precomputed variance mask
    ])                                          # (4, Hp)
    b2p = jnp.pad(b2.astype(f32), (0, cp - n_cls)).reshape(1, cp)

    # VMEM limit: actual footprint + margin, clamped to the physical capacity
    # of the current generation (no stray 2x on top of the buffer counts).
    need = _need(tk, 1 if nk == 1 else 2)
    vmem_limit = int(min(max(need + (4 << 20), 32 << 20), int(vmem_cap * 0.9)))

    const = lambda i, k: (0, 0)
    kernel = functools.partial(_classifier_kernel,
                               hidden_dim=h_dim, hidden_pad=hp)

    out = pl.pallas_call(
        kernel,
        out_shape=jax.ShapeDtypeStruct((B, cp), jnp.float32),
        grid_spec=pltpu.PrefetchScalarGridSpec(
            num_scalar_prefetch=0,
            grid=(nb, nk),
            in_specs=[
                pl.BlockSpec((bt, tk), lambda i, k: (i, k)),        # x tile
                _spec((tk, hp), lambda i, k: (k, 0), nk == 1),      # W1
                _spec((4, hp), const, True),                        # b1/gamma/beta/mask
                _spec((hp, cp), const, True),                       # W2 (resident)
                _spec((1, cp), const, True),                        # b2
            ],
            out_specs=pl.BlockSpec((bt, cp), lambda i, k: (i, 0)),
            scratch_shapes=[pltpu.VMEM((bt, hp), jnp.float32)],
        ),
        compiler_params=pltpu.CompilerParams(
            dimension_semantics=("parallel", "arbitrary"),
            vmem_limit_bytes=vmem_limit),
    )(xp, w1p, lnp, w2p, b2p)

    # Only the padded logit columns need slicing (they are exact zeros
    # because W2/b2 padding is zero); the batch dim was never padded.
    return out if cp == n_cls else out[:, :n_cls]


def _reference(x, w1, b1, gamma, beta, w2, b2):
    h = jnp.maximum(x @ w1 + b1, 0.0)
    mean = jnp.mean(h, axis=-1, keepdims=True)
    var = jnp.mean((h - mean) ** 2, axis=-1, keepdims=True)
    h = (h - mean) / jnp.sqrt(var + 1e-5) * gamma + beta
    return h @ w2 + b2


def _make_params(key, d_in, h_dim, n_cls):
    kw1, kb1, kw2, kb2 = jax.random.split(key, 4)
    lim1 = 1.0 / (d_in ** 0.5)
    w1 = jax.random.uniform(kw1, (d_in, h_dim), jnp.float32, -lim1, lim1)
    b1 = jax.random.uniform(kb1, (h_dim,), jnp.float32, -lim1, lim1)
    gamma = jnp.ones((h_dim,), jnp.float32)    # LayerNorm weight init
    beta = jnp.zeros((h_dim,), jnp.float32)    # LayerNorm bias init
    lim2 = 1.0 / (h_dim ** 0.5)
    w2 = jax.random.uniform(kw2, (h_dim, n_cls), jnp.float32, -lim2, lim2)
    b2 = jax.random.uniform(kb2, (n_cls,), jnp.float32, -lim2, lim2)
    return w1, b1, gamma, beta, w2, b2


if __name__ == "__main__":
    key = jax.random.PRNGKey(0)
    k_x1, k_p1, k_x2, k_p2 = jax.random.split(key, 4)

    # Primary small-shape check (shapes consistent with the module forward):
    #   x: (batch, input_dim) -> logits: (batch, num_classes)
    batch, input_dim, hidden_dim, num_classes = 8, 64, 32, 8
    x = jax.random.normal(k_x1, (batch, input_dim), dtype=jnp.float32)
    params = _make_params(k_p1, input_dim, hidden_dim, num_classes)

    out = jax.block_until_ready(embedding_classifier_fwd(x, *params))
    ref = _reference(x, *params)
    assert out.shape == (batch, num_classes)
    assert jnp.allclose(out, ref, atol=1e-4, rtol=1e-4)

    # Secondary check: ragged batch edge + forced K-streaming path.
    bB, dD, hH, cC = 37, 300, 96, 5
    x2 = jax.random.normal(k_x2, (bB, dD), dtype=jnp.float32)
    params2 = _make_params(k_p2, dD, hH, cC)
    out2 = jax.block_until_ready(
        embedding_classifier_fwd(x2, *params2, batch_tile=16, k_tile=128))
    ref2 = _reference(x2, *params2)
    assert out2.shape == (bB, cC)
    assert jnp.allclose(out2, ref2, atol=2e-3, rtol=2e-3)

    print("KERNEL_OK")
</pallas_src>

<mosaic_0001>
module attributes {stable_mosaic.version = 11 : i64} {
  func.func @_classifier_kernel(%arg0: i32, %arg1: i32, %arg2: memref<8x128xf32, #tpu.memory_space<vmem>>, %arg3: memref<128x128xf32, #tpu.memory_space<vmem>>, %arg4: memref<4x128xf32, #tpu.memory_space<vmem>>, %arg5: memref<128x128xf32, #tpu.memory_space<vmem>>, %arg6: memref<1x128xf32, #tpu.memory_space<vmem>>, %arg7: memref<8x128xf32, #tpu.memory_space<vmem>>, %arg8: memref<8x128xf32, #tpu.memory_space<vmem>>) attributes {dimension_semantics = [#tpu.dimension_semantics<parallel>, #tpu.dimension_semantics<arbitrary>], iteration_bounds = array<i64: 1, 1>, scalar_prefetch = 0 : i64, scratch_operands = 1 : i64, tpu.core_type = #tpu.core_type<tc>, window_params = [{transform_indices = @transform_0, window_bounds = array<i64: 8, 128>}, {pipeline_mode = #tpu.pipeline_mode<synchronous>, transform_indices = @transform_1, window_bounds = array<i64: 128, 128>}, {pipeline_mode = #tpu.pipeline_mode<synchronous>, transform_indices = @transform_2, window_bounds = array<i64: 4, 128>}, {pipeline_mode = #tpu.pipeline_mode<synchronous>, transform_indices = @transform_3, window_bounds = array<i64: 128, 128>}, {pipeline_mode = #tpu.pipeline_mode<synchronous>, transform_indices = @transform_4, window_bounds = array<i64: 1, 128>}, {transform_indices = @transform_5, window_bounds = array<i64: 8, 128>}]} {
    %c0_i32 = arith.constant 0 : i32
    %0 = arith.cmpi eq, %arg1, %c0_i32 : i32
    %1 = arith.extui %0 : i1 to i32
    %c0_i32_0 = arith.constant 0 : i32
    %2 = arith.cmpi ne, %1, %c0_i32_0 : i32
    scf.if %2 {
      %cst_10 = arith.constant 0.000000e+00 : f32
      %12 = vector.broadcast %cst_10 : f32 to vector<8x128xf32>
      %c0_11 = arith.constant 0 : index
      %c0_12 = arith.constant 0 : index
      %13 = vector.load %arg8[%c0_11, %c0_12] : memref<8x128xf32, #tpu.memory_space<vmem>>, vector<8x128xf32>
      tpu.vector_store %arg8[%c0_11, %c0_12], %12 {strides = array<i32>} : memref<8x128xf32, #tpu.memory_space<vmem>>, vector<8x128xf32>,
    } else {
    }
    %c0 = arith.constant 0 : index
    %c0_1 = arith.constant 0 : index
    %3 = vector.load %arg8[%c0, %c0_1] : memref<8x128xf32, #tpu.memory_space<vmem>>, vector<8x128xf32>
    %c0_2 = arith.constant 0 : index
    %c0_3 = arith.constant 0 : index
    %4 = vector.load %arg2[%c0_2, %c0_3] : memref<8x128xf32, #tpu.memory_space<vmem>>, vector<8x128xf32>
    %c0_4 = arith.constant 0 : index
    %c0_5 = arith.constant 0 : index
    %5 = vector.load %arg3[%c0_4, %c0_5] : memref<128x128xf32, #tpu.memory_space<vmem>>, vector<128x128xf32>
    %cst = arith.constant dense<0.000000e+00> : vector<8x128xf32>
    %6 = tpu.matmul %4, %5, %cst {dimension_numbers = #tpu.dot_dimension_numbers<[1], [0], [0], [1], [0, 0, 1, 1], [], []>} : vector<8x128xf32>, vector<128x128xf32>, vector<8x128xf32> -> vector<8x128xf32>
    %7 = arith.addf %3, %6 : vector<8x128xf32>
    %c0_6 = arith.constant 0 : index
    %c0_7 = arith.constant 0 : index
    %8 = vector.load %arg8[%c0_6, %c0_7] : memref<8x128xf32, #tpu.memory_space<vmem>>, vector<8x128xf32>
    tpu.vector_store %arg8[%c0_6, %c0_7], %7 {strides = array<i32>} : memref<8x128xf32, #tpu.memory_space<vmem>>, vector<8x128xf32>,
    %c0_i32_8 = arith.constant 0 : i32
    %9 = arith.cmpi eq, %arg1, %c0_i32_8 : i32
    %10 = arith.extui %9 : i1 to i32
    %c0_i32_9 = arith.constant 0 : i32
    %11 = arith.cmpi ne, %10, %c0_i32_9 : i32
    scf.if %11 {
      %c0_10 = arith.constant 0 : index
      %c0_11 = arith.constant 0 : index
      %12 = vector.load %arg4[%c0_10, %c0_11] : memref<4x128xf32, #tpu.memory_space<vmem>>, vector<4x128xf32>
      %13 = vector.extract_strided_slice %12 {offsets = [0, 0], sizes = [1, 128], strides = [1, 1]} : vector<4x128xf32> to vector<1x128xf32>
      %14 = vector.extract_strided_slice %12 {offsets = [1, 0], sizes = [1, 128], strides = [1, 1]} : vector<4x128xf32> to vector<1x128xf32>
      %15 = vector.extract_strided_slice %12 {offsets = [2, 0], sizes = [1, 128], strides = [1, 1]} : vector<4x128xf32> to vector<1x128xf32>
      %16 = vector.extract_strided_slice %12 {offsets = [3, 0], sizes = [1, 128], strides = [1, 1]} : vector<4x128xf32> to vector<1x128xf32>
      %c0_12 = arith.constant 0 : index
      %c0_13 = arith.constant 0 : index
      %17 = vector.load %arg8[%c0_12, %c0_13] : memref<8x128xf32, #tpu.memory_space<vmem>>, vector<8x128xf32>
      %18 = vector.broadcast %13 : vector<1x128xf32> to vector<8x128xf32>
      %19 = arith.addf %17, %18 : vector<8x128xf32>
      %cst_14 = arith.constant 0.000000e+00 : f32
      %20 = vector.broadcast %cst_14 : f32 to vector<8x128xf32>
      %21 = arith.maximumf %19, %20 : vector<8x128xf32>
      %cst_15 = arith.constant dense<0.000000e+00> : vector<8xf32>
      %22 = vector.multi_reduction <add>, %21, %cst_15 [1] : vector<8x128xf32> to vector<8xf32>
      %23 = vector.shape_cast %22 : vector<8xf32> to vector<8x1xf32>
      %cst_16 = arith.constant 3.125000e-02 : f32
      %24 = vector.broadcast %cst_16 : f32 to vector<8x1xf32>
      %25 = arith.mulf %23, %24 : vector<8x1xf32>
      %26 = vector.broadcast %25 : vector<8x1xf32> to vector<8x128xf32>
      %27 = arith.subf %21, %26 : vector<8x128xf32>
      %28 = arith.mulf %27, %27 : vector<8x128xf32>
      %29 = vector.broadcast %16 : vector<1x128xf32> to vector<8x128xf32>
      %30 = arith.mulf %28, %29 : vector<8x128xf32>
      %cst_17 = arith.constant dense<0.000000e+00> : vector<8xf32>
      %31 = vector.multi_reduction <add>, %30, %cst_17 [1] : vector<8x128xf32> to vector<8xf32>
      %32 = vector.shape_cast %31 : vector<8xf32> to vector<8x1xf32>
      %cst_18 = arith.constant 3.125000e-02 : f32
      %33 = vector.broadcast %cst_18 : f32 to vector<8x1xf32>
      %34 = arith.mulf %32, %33 : vector<8x1xf32>
      %cst_19 = arith.constant 9.99999974E-6 : f32
      %35 = vector.broadcast %cst_19 : f32 to vector<8x1xf32>
      %36 = arith.addf %34, %35 : vector<8x1xf32>
      %37 = math.rsqrt %36 : vector<8x1xf32>
      %38 = vector.broadcast %37 : vector<8x1xf32> to vector<8x128xf32>
      %39 = arith.mulf %27, %38 : vector<8x128xf32>
      %40 = vector.broadcast %14 : vector<1x128xf32> to vector<8x128xf32>
      %41 = arith.mulf %39, %40 : vector<8x128xf32>
      %42 = vector.broadcast %15 : vector<1x128xf32> to vector<8x128xf32>
      %43 = arith.addf %41, %42 : vector<8x128xf32>
      %c0_20 = arith.constant 0 : index
      %c0_21 = arith.constant 0 : index
      %44 = vector.load %arg5[%c0_20, %c0_21] : memref<128x128xf32, #tpu.memory_space<vmem>>, vector<128x128xf32>
      %cst_22 = arith.constant dense<0.000000e+00> : vector<8x128xf32>
      %45 = tpu.matmul %43, %44, %cst_22 {dimension_numbers = #tpu.dot_dimension_numbers<[1], [0], [0], [1], [0, 0, 1, 1], [], []>} : vector<8x128xf32>, vector<128x128xf32>, vector<8x128xf32> -> vector<8x128xf32>
      %c0_23 = arith.constant 0 : index
      %c0_24 = arith.constant 0 : index
      %46 = vector.load %arg6[%c0_23, %c0_24] : memref<1x128xf32, #tpu.memory_space<vmem>>, vector<1x128xf32>
      %47 = vector.broadcast %46 : vector<1x128xf32> to vector<8x128xf32>
      %48 = arith.addf %45, %47 : vector<8x128xf32>
      %c0_25 = arith.constant 0 : index
      %c0_26 = arith.constant 0 : index
      %49 = vector.load %arg7[%c0_25, %c0_26] : memref<8x128xf32, #tpu.memory_space<vmem>>, vector<8x128xf32>
      tpu.vector_store %arg7[%c0_25, %c0_26], %48 {strides = array<i32>} : memref<8x128xf32, #tpu.memory_space<vmem>>, vector<8x128xf32>,
    } else {
    }
    return
  }
  func.func @transform_0(%arg0: i32, %arg1: i32) -> (i32, i32) {
    %c0_i32 = arith.constant 0 : i32
    return %arg0, %arg1 : i32, i32
  }
  func.func @transform_1(%arg0: i32, %arg1: i32) -> (i32, i32) {
    %c0_i32 = arith.constant 0 : i32
    %c0_i32_0 = arith.constant 0 : i32
    return %arg1, %c0_i32 : i32, i32
  }
  func.func @transform_2(%arg0: i32, %arg1: i32) -> (i32, i32) {
    %c0_i32 = arith.constant 0 : i32
    %c0_i32_0 = arith.constant 0 : i32
    %c0_i32_1 = arith.constant 0 : i32
    return %c0_i32, %c0_i32_0 : i32, i32
  }
  func.func @transform_3(%arg0: i32, %arg1: i32) -> (i32, i32) {
    %c0_i32 = arith.constant 0 : i32
    %c0_i32_0 = arith.constant 0 : i32
    %c0_i32_1 = arith.constant 0 : i32
    return %c0_i32, %c0_i32_0 : i32, i32
  }
  func.func @transform_4(%arg0: i32, %arg1: i32) -> (i32, i32) {
    %c0_i32 = arith.constant 0 : i32
    %c0_i32_0 = arith.constant 0 : i32
    %c0_i32_1 = arith.constant 0 : i32
    return %c0_i32, %c0_i32_0 : i32, i32
  }
  func.func @transform_5(%arg0: i32, %arg1: i32) -> (i32, i32) {
    %c0_i32 = arith.constant 0 : i32
    %c0_i32_0 = arith.constant 0 : i32
    return %arg0, %c0_i32 : i32, i32
  }
}

</mosaic_0001>

<bundles_post_ra>
// kernel: embedding_classifier_fwd.1
= control target key start
LH: loop header
LB: loop body
LE: loop exit
PB: predicated region body
PF: predicated region fallthrough
CT: control target
= control target key end

     0   :  { %s332_s0 = inlined_call_operand.vmem [shape: f32[8,128], index: 0, kind: input, shape index: {}]   ;;  %s333_s1 = inlined_call_operand.vmem [shape: f32[128,128], index: 1, kind: input, shape index: {}]   ;;  %s334_s2 = inlined_call_operand.vmem [shape: f32[4,128], index: 2, kind: input, shape index: {}]   ;;  %s335_s3 = inlined_call_operand.vmem [shape: f32[128,128], index: 3, kind: input, shape index: {}]   ;;  %s336_s4 = inlined_call_operand.vmem [shape: f32[1,128], index: 4, kind: input, shape index: {}]   ;;  %s337_s5 = inlined_call_operand.hbm [shape: f32[8,128], index: 5, kind: output, shape index: {}]  }
   0x1   :  { %v43_v0 = vld [vmem:[%s333_s1 + $0x78] sm:$0xff]  ;;  %v42_v1 = vld [vmem:[%s333_s1 + $0x70] sm:$0xff]  ;;  %v41_v2 = vld [vmem:[%s333_s1 + $0x68] sm:$0xff] }
   0x2   :  { %44 = vmatpush.msra.mxu0 %v43_v0  ;;  %v40_v3 = vld [vmem:[%s333_s1 + $0x60] sm:$0xff]  ;;  %v39_v4 = vld [vmem:[%s333_s1 + $0x58] sm:$0xff] }
   0x4   :  { %45 = vmatpush.msra.mxu0 %v42_v1 }
   0x6   :  { %46 = vmatpush.msra.mxu0 %v41_v2 }
   0x7   :  { %10 = vsyncpa [#allocation4], 0  ;;  %v38_v5 = vld [vmem:[%s333_s1 + $0x50] sm:$0xff]  ;;  %v37_v6 = vld [vmem:[%s333_s1 + $0x48] sm:$0xff]  ;;  %s148_s10 = sshll.u32 %s337_s5, 4  ;;  %s149_s10 = int_to_ptr.hbm [resolvable:$true] %s148_s10 }
   0x8   :  { %47 = vmatpush.msra.mxu0 %v40_v3  ;;  %v36_v7 = vld [vmem:[%s333_s1 + $0x40] sm:$0xff]  ;;  %v35_v8 = vld [vmem:[%s333_s1 + $0x38] sm:$0xff]  ;;  %v34_v9 = vld [vmem:[%s333_s1 + $0x30] sm:$0xff] }
   0x9   :  { %v33_v10 = vld [vmem:[%s333_s1 + $0x28] sm:$0xff]  ;;  %v32_v11 = vld [vmem:[%s333_s1 + $0x20] sm:$0xff]  ;;  %v31_v12 = vld [vmem:[%s333_s1 + $0x18] sm:$0xff] }
   0xa   :  { %48 = vmatpush.msra.mxu0 %v39_v4  ;;  %v30_v13 = vld [vmem:[%s333_s1 + $0x10] sm:$0xff]  ;;  %v29_v14 = vld [vmem:[%s333_s1 + $0x8] sm:$0xff]  ;;  %v28_v15 = vld [vmem:[%s333_s1] sm:$0xff] }
   0xb   :  { %v27_v16 = vld [vmem:[%s332_s0] sm:$0xff]  ;;  %v115_v22 = vld [vmem:[%s335_s3 + $0x78] sm:$0xff]  ;;  %v114_v23 = vld [vmem:[%s335_s3 + $0x70] sm:$0xff] }
   0xc   :  { %49 = vmatpush.msra.mxu0 %v38_v5  ;;  %v272_v17 = vld [vmem:[%s334_s2] sm:$0xf]  ;;  %120 = vmatpush.msra.mxu1 %v115_v22  ;;  %v113_v30 = vld [vmem:[%s335_s3 + $0x68] sm:$0xff]  ;;  %v111_v32 = vld [vmem:[%s335_s3 + $0x58] sm:$0xff]  ;;  %s187_s2 = smov [#allocation3]  }
   0xd   :  { %v71_v18 = vperm.slane %v272_v17, 0  ;;  %v79_v27 = vperm.slane %v272_v17, 3  ;;  %v112_v31 = vld [vmem:[%s335_s3 + $0x60] sm:$0xff]  ;;  %v110_v33 = vld [vmem:[%s335_s3 + $0x50] sm:$0xff]  ;;  %v109_v34 = vld [vmem:[%s335_s3 + $0x48] sm:$0xff]  ;;  %v96_v53 = vperm.slane %v272_v17, 1 }
   0xe   :  { %50 = vmatpush.msra.mxu0 %v37_v6  ;;  %121 = vmatpush.msra.mxu1 %v114_v23  ;;  %v108_v35 = vld [vmem:[%s335_s3 + $0x40] sm:$0xff]  ;;  %v107_v36 = vld [vmem:[%s335_s3 + $0x38] sm:$0xff]  ;;  %v106_v37 = vld [vmem:[%s335_s3 + $0x30] sm:$0xff]  ;;  %v98_v56 = vperm.slane %v272_v17, 2  ;;  %s146_s7 = sshll.u32 %s187_s2, 4  ;;  %s147_s7 = int_to_ptr.vmem [resolvable:$true] %s146_s7 }
   0xf   :  { %v105_v38 = vld [vmem:[%s335_s3 + $0x28] sm:$0xff]  ;;  %v104_v39 = vld [vmem:[%s335_s3 + $0x20] sm:$0xff]  ;;  %v103_v40 = vld [vmem:[%s335_s3 + $0x18] sm:$0xff] }
  0x10   :  { %51 = vmatpush.msra.mxu0 %v36_v7  ;;  %122 = vmatpush.msra.mxu1 %v113_v30  ;;  %v102_v41 = vld [vmem:[%s335_s3 + $0x10] sm:$0xff]  ;;  %v101_v42 = vld [vmem:[%s335_s3 + $0x8] sm:$0xff]  ;;  %v100_v43 = vld [vmem:[%s335_s3] sm:$0xff] }
  0x11   :  { %v158_v59 = vld [vmem:[%s336_s4] ss:$0 sm:$0xff] }
  0x12   :  { %52 = vmatpush.msra.mxu0 %v35_v8  ;;  %123 = vmatpush.msra.mxu1 %v112_v31 }
  0x14   :  { %53 = vmatpush.msra.mxu0 %v34_v9  ;;  %124 = vmatpush.msra.mxu1 %v111_v32 }
  0x16   :  { %54 = vmatpush.msra.mxu0 %v33_v10  ;;  %125 = vmatpush.msra.mxu1 %v110_v33 }
  0x18   :  { %55 = vmatpush.msra.mxu0 %v32_v11  ;;  %126 = vmatpush.msra.mxu1 %v109_v34 }
  0x1a   :  { %56 = vmatpush.msra.mxu0 %v31_v12  ;;  %127 = vmatpush.msra.mxu1 %v108_v35 }
  0x1c   :  { %57 = vmatpush.msra.mxu0 %v30_v13  ;;  %128 = vmatpush.msra.mxu1 %v107_v36 }
  0x1e   :  { %58 = vmatpush.msra.mxu0 %v29_v14  ;;  %129 = vmatpush.msra.mxu1 %v106_v37 }
  0x20   :  { %59 = vmatpush.msra.mxu0 %v28_v15  ;;  %130 = vmatpush.msra.mxu1 %v105_v38 }
  0x21   :  { %60 = vmatmul.f32.vlgmr.msra.gmra.mxu0 %v27_v16 }
  0x22   :  { %131 = vmatpush.msra.mxu1 %v104_v39 }
  0x24   :  { %132 = vmatpush.msra.mxu1 %v103_v40 }
  0x26   :  { %133 = vmatpush.msra.mxu1 %v102_v41 }
  0x28   :  { %134 = vmatpush.msra.mxu1 %v101_v42 }
  0x2a   :  { %135 = vmatpush.msra.mxu1 %v100_v43 }
  0x9e   :  { %v61_v19 = vpop.f32.mrf.mxu0 }
  0x9f   :  { %v72_v20 = vadd.f32 %v71_v18, %v61_v19 }
  0xa1   :  { %v73_v21 = vmax.f32 %v72_v20, 0.0 }
  0xa3   :  { %74 = vadd.xlane.f32.xlu0 %v73_v21 }
 0x116   :  { %v75_v24 = vpop.xlane.xlu0 %74 }
 0x117   :  { %v76_v25 = vmul.f32 0.03125, %v75_v24 }
 0x119   :  { %v77_v26 = vsub.f32 %v73_v21, %v76_v25 }
 0x11b   :  { %v78_v28 = vmul.f32 %v77_v26, %v77_v26 }
 0x11d   :  { %v80_v29 = vmul.f32 %v79_v27, %v78_v28 }
 0x11f   :  { %81 = vadd.xlane.f32.xlu0 %v80_v29 }
 0x192   :  { %v82_v44 = vpop.xlane.xlu0 %81 }
 0x193   :  { %v83_v45 = vmul.f32 0.03125, %v82_v44 }
 0x195   :  { %v84_v46 = vadd.f32 1e-05, %v83_v45 }
 0x197   :  { %159 = vrsqrt.f32 %v84_v46  ;;  %vm91_vm1 = vweird.f32 %v84_v46 }
 0x19d   :  { %v160_v47 = vpop.eup %159 }
 0x19e   :  { %v86_v48 = vmul.f32 %v160_v47, %v84_v46  ;;  %vm92_vm0 = vweird.f32 %v160_v47 }
 0x19f   :  { %vm93_vm2 = vmor %vm91_vm1, %vm92_vm0 }
 0x1a0   :  { %v87_v49 = vmul.f32 %v160_v47, %v86_v48 }
 0x1a2   :  { %v88_v50 = vmul.f32 0.5, %v87_v49 }
 0x1a4   :  { %v89_v51 = vsub.f32 1.5, %v88_v50 }
 0x1a6   :  { %v90_v52 = vmul.f32 %v160_v47, %v89_v51 }
 0x1a8   :  { %v94_v54 = vsel %vm93_vm2, %v160_v47, %v90_v52 }
 0x1a9   :  { %v95_v55 = vmul.f32 %v94_v54, %v77_v26 }
 0x1ab   :  { %v97_v57 = vmul.f32 %v96_v53, %v95_v55 }
 0x1ad   :  { %v99_v58 = vadd.f32 %v98_v56, %v97_v57 }
 0x1af   :  { %136 = vmatmul.f32.vlgmr.msra.gmra.mxu1 %v99_v58 }
 0x22c   :  { %v137_v60 = vpop.f32.mrf.mxu1 }
 0x22d   :  { %v138_v61 = vadd.f32 %v158_v59, %v137_v60 }
 0x22f   :  { %140 = vst [vmem:[#allocation3] sm:$0xff] %v138_v61 }
 0x230   :  { %151 = dma.vmem_to_hbm [thread:$0]  %s147_s7, 128, %s149_s10, [#allocation4]  }
 0x231   :  { %185 = dma.done.wait [#allocation4], 128  }
 0x232   :  { %186 = vsyncadd [#allocation4], 4294967168 }
 0x233   :  { %156 = vsyncpa [#allocation4], 1 }

</bundles_post_ra>
